<compile_context>
chip_gen: v7x
topology: tpu7x:2x2x1
jax: 0.10.0
libtpu: 0.0.40
codegen_flags: <defaults>
</compile_context>

<pallas_src>
import jax
import jax.numpy as jnp
from jax.experimental import pallas as pl
from jax.experimental.pallas import tpu as pltpu


MAX_LANES = 512                       # widest lane-dense slab width we try
MIN_PALLAS_BYTES = 256 * 1024         # below this, plain XLA add wins
VMEM_LIMIT_BYTES = 48 * 1024 * 1024   # headroom for 4 x tile double-buffering


def _add_kernel(x_ref, o_ref):
    # FloatFunctional.add in float (non-quantized) mode is a plain tensor add;
    # the "clone" operand is identical to x, so compute x + x from one stream.
    x = x_ref[...]
    o_ref[...] = x + x


def _sublane_multiple(dtype) -> int:
    # minimum second-to-last tile dim for packed dtypes
    itemsize = jnp.dtype(dtype).itemsize
    return {4: 8, 2: 16, 1: 32}.get(itemsize, 8)


def _max_tile_bytes() -> int:
    # v7x: 3.2 TB/s HBM makes the ~0.35 us per-grid-step overhead ~2x as costly
    # in lost streaming, so prefer ~8 MiB tiles (32 MiB live with double
    # buffering, still under the 48 MiB limit / 64 MiB physical VMEM per TC).
    # v5e/v6e: ~4 MiB tiles are at/near the measured roofline sweet spot.
    try:
        kind = jax.devices()[0].device_kind.lower()
    except Exception:
        kind = ""
    if "v7" in kind:
        return 8 * 1024 * 1024
    return 4 * 1024 * 1024


def _pallas_double(x2d: jax.Array, rows: int, lanes: int, dtype) -> jax.Array:
    """Compute x2d + x2d for a (rows, lanes) slab via a tiled Pallas kernel."""
    itemsize = jnp.dtype(dtype).itemsize
    sub = _sublane_multiple(dtype)
    bytes_per_row = lanes * itemsize

    # Byte-based tile sizing, rounded down to the sublane multiple.
    tile_budget_rows = max(sub, (_max_tile_bytes() // bytes_per_row) // sub * sub)

    if rows <= sub:
        # Full-dim block along rows: exempt from the (8,128) divisibility rule.
        tile_rows = rows
    else:
        # Cap at ~half the rows so the grid has >= 2 steps and v7x's two
        # TensorCores both get a share of the "parallel" axis.
        half_rows = ((pl.cdiv(rows, 2) + sub - 1) // sub) * sub
        tile_rows = min(tile_budget_rows, half_rows)

    grid = (pl.cdiv(rows, tile_rows),)   # partial last block handled by Pallas

    return pl.pallas_call(
        _add_kernel,
        out_shape=jax.ShapeDtypeStruct((rows, lanes), dtype),
        grid_spec=pl.GridSpec(
            grid=grid,
            in_specs=[pl.BlockSpec((tile_rows, lanes), lambda i: (i, 0))],
            out_specs=pl.BlockSpec((tile_rows, lanes), lambda i: (i, 0)),
        ),
        compiler_params=pltpu.CompilerParams(
            dimension_semantics=("parallel",),
            vmem_limit_bytes=VMEM_LIMIT_BYTES,
        ),
        cost_estimate=pl.CostEstimate(
            flops=rows * lanes,
            transcendentals=0,
            bytes_accessed=2 * rows * lanes * itemsize,
        ),
    )(x2d)


def add_model_forward(x: jax.Array) -> jax.Array:
    """Pallas implementation of AddModel.forward: ff.add(x, x.clone()) == x + x."""
    orig_shape = x.shape
    dtype = x.dtype
    n = x.size
    itemsize = jnp.dtype(dtype).itemsize

    # Tiny-input bypass: launch + wrapper overhead dominates; XLA's fused
    # elementwise add is strictly better here.
    if n == 0 or n * itemsize < MIN_PALLAS_BYTES:
        return x + x

    flat = x.reshape(-1)   # contiguous row-major reshape -> bitcast, no copy

    # Zero-copy fast path: widest lane count (multiple of 128) dividing n.
    for lanes in (512, 256, 128):
        if n % lanes == 0:
            rows = n // lanes
            out2d = _pallas_double(flat.reshape(rows, lanes), rows, lanes, dtype)
            return out2d.reshape(orig_shape)

    # Ragged size: run the kernel on the 512-aligned prefix and add only the
    # (< 512 element) tail with plain JAX, instead of padding/slicing the whole
    # array (which would roughly triple HBM traffic).
    lanes = MAX_LANES
    n_main = (n // lanes) * lanes
    rows = n_main // lanes
    main_out = _pallas_double(flat[:n_main].reshape(rows, lanes), rows, lanes, dtype)
    tail = flat[n_main:]
    # TODO(synk): the prefix slice + final concatenate still cost ~2 extra array
    # copies in XLA; a fully copy-free ragged path would need a 1-D blocked kernel.
    out = jnp.concatenate([main_out.reshape(-1), tail + tail])
    return out.reshape(orig_shape)


if __name__ == "__main__":
    key = jax.random.PRNGKey(0)
    k1, k2, k3 = jax.random.split(key, 3)

    # 1) Spec shape from the PyTorch module (small NCHW): takes the tiny-input
    #    bypass, which is the right perf call at 8 KiB.
    x_small = jax.random.normal(k1, (2, 4, 16, 16), dtype=jnp.float32)
    # 2) LANES-aligned tensor large enough to exercise the zero-copy Pallas fast
    #    path with a multi-step ("parallel") grid.
    x_big = jax.random.normal(k2, (8, 8, 64, 64), dtype=jnp.float32)
    # 3) Ragged size exercising the aligned-prefix kernel + tail path and the
    #    partial-last-block grid.
    x_ragged = jax.random.normal(k3, (3, 7, 111, 97), dtype=jnp.float32)

    for x in (x_small, x_big, x_ragged):
        out = jax.block_until_ready(add_model_forward(x))
        ref = x + x   # FloatFunctional.add(x, x.clone()) == 2 * x
        assert out.shape == x.shape, "shape mismatch"
        assert out.dtype == x.dtype, "dtype mismatch"
        assert jnp.allclose(out, ref, atol=1e-6, rtol=1e-6), "mismatch vs reference"

    print("KERNEL_OK")
</pallas_src>

<mosaic_0001>
module attributes {stable_mosaic.version = 11 : i64} {
  func.func @_add_kernel(%arg0: i32, %arg1: memref<256x512xf32, #tpu.memory_space<vmem>>, %arg2: memref<256x512xf32, #tpu.memory_space<vmem>>) attributes {dimension_semantics = [#tpu.dimension_semantics<parallel>], iteration_bounds = array<i64: 2>, scalar_prefetch = 0 : i64, scratch_operands = 0 : i64, tpu.core_type = #tpu.core_type<tc>, window_params = [{transform_indices = @transform_0, window_bounds = array<i64: 256, 512>}, {transform_indices = @transform_1, window_bounds = array<i64: 256, 512>}]} {
    %c0 = arith.constant 0 : index
    %c0_0 = arith.constant 0 : index
    %0 = vector.load %arg1[%c0, %c0_0] : memref<256x512xf32, #tpu.memory_space<vmem>>, vector<256x512xf32>
    %1 = arith.addf %0, %0 : vector<256x512xf32>
    %c0_1 = arith.constant 0 : index
    %c0_2 = arith.constant 0 : index
    %2 = vector.load %arg2[%c0_1, %c0_2] : memref<256x512xf32, #tpu.memory_space<vmem>>, vector<256x512xf32>
    tpu.vector_store %arg2[%c0_1, %c0_2], %1 {strides = array<i32>} : memref<256x512xf32, #tpu.memory_space<vmem>>, vector<256x512xf32>,
    return
  }
  func.func @transform_0(%arg0: i32) -> (i32, i32) {
    %c0_i32 = arith.constant 0 : i32
    %c0_i32_0 = arith.constant 0 : i32
    return %arg0, %c0_i32 : i32, i32
  }
  func.func @transform_1(%arg0: i32) -> (i32, i32) {
    %c0_i32 = arith.constant 0 : i32
    %c0_i32_0 = arith.constant 0 : i32
    return %arg0, %c0_i32 : i32, i32
  }
}

</mosaic_0001>

<bundles_post_ra>
// kernel: tpu_custom_call.1
= control target key start
LH: loop header
LB: loop body
LE: loop exit
PB: predicated region body
PF: predicated region fallthrough
CT: control target
= control target key end

     0   :  { %6 = vsyncpa [#allocation3], 0  ;;  %s1217_s0 = inlined_call_operand.hbm [shape: f32[512,512], index: 0, kind: input, shape index: {}]   ;;  %s1218_s1 = inlined_call_operand.hbm [shape: f32[512,512], index: 1, kind: output, shape index: {}]  }
   0x1   :  { %8 = vsyncpa [#allocation3 + $0x1], 0 }
   0x2   :  { %9 = vsyncpa [#allocation4], 0 }
   0x3   :  { %11 = vsyncpa [#allocation4 + $0x1], 0  ;;  %s794_s6 = smov 0   ;;  %s796_s7 = smov 0  }
   0x4   :  { %s798_s8 = smov 0   ;;  %s800_s9 = smov 0  }
   0x5 LB: > { %s815_s10 = sadd.s32 4294967295, %s776_s9   ;;  %s610_s11 = sadd.s32 4294967294, %s776_s9   ;;  %s776_s9 = sphi %s800_s9, %s1231_s9   ;;  %s772_s8 = sphi %s798_s8, %s1230_s8   ;;  %s768_s7 = sphi %s796_s7, %s1229_s7   ;;  %s764_s6 = sphi %s794_s6, %s1228_s6  }
   0x6   : > { %s819_s12 = sadd.s32 1, %s776_s9   ;;  %s24_s13 = sadd.s32 1, %s772_s8 }
   0x7   : > { %s21_s14 = ssub.s32 %s776_s9, %s819_s12  ;;  %p31_p0 = scmp.ne.s32.totalorder %s772_s8, %s768_s7 }
   0x8   : > { %p22_p1 = scmp.eq.s32.totalorder %s21_s14, 0  ;;  %p32_p2 = scmp.eq.s32.totalorder %s776_s9, 0 }
   0x9   : > { %p37_p3 = scmp.ne.s32.totalorder %s768_s7, %s764_s6  ;;  %p38_p4 = scmp.eq.s32.totalorder %s815_s10, 0 }
   0xa   : > { %s831_s15 = scalar_select %p22_p1, %s772_s8, %s24_s13  }
   0xb   : > { %p833_p5 = por %p32_p2, %p31_p0  ;;  %p837_p6 = por %p38_p4, %p37_p3 }
   0xc   : > { %p61_p7 = scmp.eq.s32.totalorder %s815_s10, 1  ;;  %p67_p8 = scmp.eq.s32.totalorder %s610_s11, 1 }
   0xd   : > { %p642_p10 = scmp.lt.s32.totalorder %s776_s9, 2  ;;  %s87_s20 = sand.u32 1, %s772_s8  }
   0xe   : > { %p844_p11 = por %p61_p7, %p31_p0  ;;  %p848_p12 = por %p67_p8, %p37_p3 }
   0xf   : > { %s627_s21 = sshll.u32 %s776_s9, 14  ;;  %s613_s22 = sshll.u32 %s87_s20, 10 }
  0x10   : > { %s1222_s18 = scalar_select %p844_p11, 1, 0 }
  0x11   : > { %s1223_s19 = scalar_select %p848_p12, 1, 0 }
  0x12   : > { %s857_s25 = scalar_lea.hbm %s1217_s0, %s627_s21  ;;  %s91_s26 = scalar_lea.vmem [#allocation2], %s613_s22 }
  0x13   : > { %s99_s27 = sshll.u32 %s91_s26, 4  ;;  %p861_p13 = pnand %p642_p10, %p833_p5  ;;  %s865_s27 = int_to_ptr.vmem [resolvable:$true] %s99_s27 }
  0x14   : > { %s867_s29 = scalar_lea.sflag [#allocation3], %s87_s20  ;;  %s680_s30 = scalar_lea.hbm %s857_s25, 16384 }
  0x15   : > { %p681_p0 = scmp.ne.s32.totalorder %s857_s25, %s680_s30  ;;  %p682_p1 = pneg %p861_p13 }
  0x16   : > { %s685_s4 = scalar_lea.hbm %s1217_s0, 32768  ;;  %p686_p4 = scmp.lt.u32.totalorder %s857_s25, %s1217_s0 }
  0x17   : > { %p683_p2 = pnand %p682_p1, %p681_p0  ;;  %p687_p5 = scmp.lt.u32.totalorder %s685_s4, %s680_s30 }
  0x18   : > { %p689_p8 = scmp.lt.u32.totalorder %s680_s30, %s857_s25 }
  0x19   : > { %p684_p3 = pneg %p683_p2  ;;  %p688_p7 = por %p687_p5, %p686_p4 }
  0x1b   : > { %p690_p10 = por %p689_p8, %p688_p7 }
  0x1d   : > { %p691_p9 = pnand %p690_p10, %p684_p3 }
  0x1f   : > { %694 = shalt.err (!%p691_p9)
}
  0x20   : > { %s695_s13 = scalar_lea.vmem %s865_s27, 16384  ;;  %s778_s14 = smov [#allocation2]  }
  0x21   : > { %p696_p0 = scmp.ne.s32.totalorder %s865_s27, %s695_s13  ;;  %s700_s16 = sshll.u32 %s778_s14, 4  ;;  %s701_s16 = int_to_ptr.vmem [resolvable:$false] %s700_s16 }
  0x22   : > { %s702_s20 = scalar_lea.vmem %s701_s16, 32768  ;;  %p703_p11 = scmp.lt.s32.totalorder %s865_s27, %s701_s16 }
  0x23   : > { %p698_p2 = pnand %p696_p0, %p682_p1  ;;  %p704_p4 = scmp.lt.s32.totalorder %s702_s20, %s695_s13 }
  0x25   : > { %p699_p12 = pneg %p698_p2  ;;  %p705_p5 = por %p704_p4, %p703_p11 }
  0x27   : > { %p706_p7 = pnand %p705_p5, %p699_p12 }
  0x29   : > { %709 = shalt.err (!%p706_p7)
}
  0x2a   : > { %s779_s21 = smov 512   ;;  %s780_s22 = smov 32  }
  0x2b   : > { %637 = dma.hbm_to_vmem [thread:$0]  (!%p861_p13), %s857_s25, 16384, %s865_s27, %s867_s29, %s779_s21, %s779_s21, %s780_s22  }
  0x2c   : > { %p617_p9 = scmp.ge.s32.totalorder %s776_s9, 1  ;;  %p107_p1 = scmp.lt.s32.totalorder %s776_s9, 3 }
  0x2e   : > { %p108_p3 = pnand %p617_p9, %p107_p1 }
  0x2f   : > { %s898_s23 = sand.u32 (!%p108_p3), 1, %s768_s7  }
  0x30   : > { %111 = sbr.rel (%p108_p3) target bundleno = 137 (0x89), region = 24  ;;  %s618_s24 = sshll.u32 (!%p108_p3), %s898_s23, 10 }
  0x31   : > { %s114_s26 = scalar_lea.sflag (!%p108_p3), [#allocation3], %s898_s23  ;;  %s902_s30 = scalar_lea.vmem (!%p108_p3), [#allocation2], %s618_s24 }
  0x37   : > { %755 = dma.done.wait (%p837_p6), %s114_s26, 16384  }
  0x38   : > { %757 = vsyncadd (%p837_p6), %s114_s26, 4294950912  ;;  %v138_v0 = vld [vmem:[%s902_s30] sm:$0xff]  ;;  %v139_v1 = vld [vmem:[%s902_s30 + $0x8] sm:$0xff]  ;;  %s917_s17 = scalar_lea.vmem [#allocation5], %s618_s24  ;;  %s629_s25 = sshll.u32 %s815_s10, 14 }
  0x39   : > { %v140_v2 = vld [vmem:[%s902_s30 + $0x10] sm:$0xff]  ;;  %v266_v3 = vadd.f32 %v138_v0, %v138_v0  ;;  %v267_v4 = vadd.f32 %v139_v1, %v139_v1  ;;  %v141_v6 = vld [vmem:[%s902_s30 + $0x18] sm:$0xff]  ;;  %v142_v7 = vld [vmem:[%s902_s30 + $0x20] sm:$0xff]  ;;  %s537_s27 = sshll.u32 %s917_s17, 4  ;;  %s1163_s29 = scalar_lea.hbm %s1218_s1, %s629_s25  ;;  %s1165_s27 = int_to_ptr.vmem [resolvable:$true] %s537_s27 }
  0x3a   : > { %v268_v5 = vadd.f32 %v140_v2, %v140_v2  ;;  %v143_v8 = vld [vmem:[%s902_s30 + $0x28] sm:$0xff]  ;;  %v269_v9 = vadd.f32 %v141_v6, %v141_v6  ;;  %v270_v10 = vadd.f32 %v142_v7, %v142_v7  ;;  %v144_v12 = vld [vmem:[%s902_s30 + $0x30] sm:$0xff]  ;;  %v145_v13 = vld [vmem:[%s902_s30 + $0x38] sm:$0xff]  ;;  %s523_s2 = scalar_lea.sflag [#allocation4], %s898_s23  ;;  %s710_s3 = scalar_lea.vmem %s1165_s27, 16384 }
  0x3b   : > { %v271_v11 = vadd.f32 %v143_v8, %v143_v8  ;;  %v146_v14 = vld [vmem:[%s902_s30 + $0x40] sm:$0xff]  ;;  %394 = vst [vmem:[%s917_s17] sm:$0xff] %v266_v3  ;;  %395 = vst [vmem:[%s917_s17 + $0x8] sm:$0xff] %v267_v4  ;;  %v272_v15 = vadd.f32 %v144_v12, %v144_v12  ;;  %v273_v16 = vadd.f32 %v145_v13, %v145_v13  ;;  %v147_v18 = vld [vmem:[%s902_s30 + $0x48] sm:$0xff]  ;;  %p711_p6 = scmp.ne.s32.totalorder %s1165_s27, %s710_s3  ;;  %p1225_p11 = scmp.ne.s32.totalorder %s1222_s18, 0 }
  0x3c   : > { %396 = vst [vmem:[%s917_s17 + $0x10] sm:$0xff] %v268_v5  ;;  %v274_v17 = vadd.f32 %v146_v14, %v146_v14  ;;  %v148_v19 = vld [vmem:[%s902_s30 + $0x50] sm:$0xff]  ;;  %v149_v20 = vld [vmem:[%s902_s30 + $0x58] sm:$0xff]  ;;  %397 = vst [vmem:[%s917_s17 + $0x18] sm:$0xff] %v269_v9  ;;  %v275_v21 = vadd.f32 %v147_v18, %v147_v18  ;;  %s781_s4 = smov [#allocation5]  }
  0x3d   : > { %398 = vst [vmem:[%s917_s17 + $0x20] sm:$0xff] %v270_v10  ;;  %399 = vst [vmem:[%s917_s17 + $0x28] sm:$0xff] %v271_v11  ;;  %v276_v22 = vadd.f32 %v148_v19, %v148_v19  ;;  %v277_v23 = vadd.f32 %v149_v20, %v149_v20  ;;  %v150_v24 = vld [vmem:[%s902_s30 + $0x60] sm:$0xff]  ;;  %v151_v25 = vld [vmem:[%s902_s30 + $0x68] sm:$0xff]  ;;  %p712_p12 = pnand %p711_p6, %p1225_p11  ;;  %s714_s5 = sshll.u32 %s781_s4, 4  ;;  %s715_s5 = int_to_ptr.vmem [resolvable:$false] %s714_s5 }
  0x3e   : > { %v152_v26 = vld [vmem:[%s902_s30 + $0x70] sm:$0xff]  ;;  %400 = vst [vmem:[%s917_s17 + $0x30] sm:$0xff] %v272_v15  ;;  %401 = vst [vmem:[%s917_s17 + $0x38] sm:$0xff] %v273_v16  ;;  %v278_v27 = vadd.f32 %v150_v24, %v150_v24  ;;  %v279_v28 = vadd.f32 %v151_v25, %v151_v25  ;;  %v153_v30 = vld [vmem:[%s902_s30 + $0x78] sm:$0xff]  ;;  %s716_s11 = scalar_lea.vmem %s715_s5, 32768  ;;  %p717_p8 = scmp.lt.s32.totalorder %s1165_s27, %s715_s5 }
  0x3f   : > { %402 = vst [vmem:[%s917_s17 + $0x40] sm:$0xff] %v274_v17  ;;  %v280_v29 = vadd.f32 %v152_v26, %v152_v26  ;;  %v154_v31 = vld [vmem:[%s902_s30 + $0x80] sm:$0xff]  ;;  %v155_v32 = vld [vmem:[%s902_s30 + $0x88] sm:$0xff]  ;;  %403 = vst [vmem:[%s917_s17 + $0x48] sm:$0xff] %v275_v21  ;;  %v281_v33 = vadd.f32 %v153_v30, %v153_v30  ;;  %p713_p13 = pneg %p712_p12  ;;  %p718_p10 = scmp.lt.s32.totalorder %s716_s11, %s710_s3 }
  0x40   : > { %404 = vst [vmem:[%s917_s17 + $0x50] sm:$0xff] %v276_v22  ;;  %405 = vst [vmem:[%s917_s17 + $0x58] sm:$0xff] %v277_v23  ;;  %v282_v34 = vadd.f32 %v154_v31, %v154_v31  ;;  %v283_v35 = vadd.f32 %v155_v32, %v155_v32  ;;  %v156_v36 = vld [vmem:[%s902_s30 + $0x90] sm:$0xff]  ;;  %v157_v37 = vld [vmem:[%s902_s30 + $0x98] sm:$0xff] }
  0x41   : > { %v158_v38 = vld [vmem:[%s902_s30 + $0xa0] sm:$0xff]  ;;  %406 = vst [vmem:[%s917_s17 + $0x60] sm:$0xff] %v278_v27  ;;  %407 = vst [vmem:[%s917_s17 + $0x68] sm:$0xff] %v279_v28  ;;  %v284_v39 = vadd.f32 %v156_v36, %v156_v36  ;;  %v285_v40 = vadd.f32 %v157_v37, %v157_v37  ;;  %v159_v42 = vld [vmem:[%s902_s30 + $0xa8] sm:$0xff]  ;;  %p719_p0 = por %p718_p10, %p717_p8 }
  0x42   : > { %408 = vst [vmem:[%s917_s17 + $0x70] sm:$0xff] %v280_v29  ;;  %v286_v41 = vadd.f32 %v158_v38, %v158_v38  ;;  %v160_v43 = vld [vmem:[%s902_s30 + $0xb0] sm:$0xff]  ;;  %v161_v44 = vld [vmem:[%s902_s30 + $0xb8] sm:$0xff]  ;;  %409 = vst [vmem:[%s917_s17 + $0x78] sm:$0xff] %v281_v33  ;;  %v287_v45 = vadd.f32 %v159_v42, %v159_v42 }
  0x43   : > { %410 = vst [vmem:[%s917_s17 + $0x80] sm:$0xff] %v282_v34  ;;  %411 = vst [vmem:[%s917_s17 + $0x88] sm:$0xff] %v283_v35  ;;  %v288_v46 = vadd.f32 %v160_v43, %v160_v43  ;;  %v289_v47 = vadd.f32 %v161_v44, %v161_v44  ;;  %v162_v48 = vld [vmem:[%s902_s30 + $0xc0] sm:$0xff]  ;;  %v163_v49 = vld [vmem:[%s902_s30 + $0xc8] sm:$0xff]  ;;  %p720_p2 = pnand %p719_p0, %p713_p13 }
  0x44   : > { %v164_v50 = vld [vmem:[%s902_s30 + $0xd0] sm:$0xff]  ;;  %412 = vst [vmem:[%s917_s17 + $0x90] sm:$0xff] %v284_v39  ;;  %413 = vst [vmem:[%s917_s17 + $0x98] sm:$0xff] %v285_v40  ;;  %v290_v51 = vadd.f32 %v162_v48, %v162_v48  ;;  %v291_v52 = vadd.f32 %v163_v49, %v163_v49  ;;  %v165_v54 = vld [vmem:[%s902_s30 + $0xd8] sm:$0xff] }
  0x45   : > { %414 = vst [vmem:[%s917_s17 + $0xa0] sm:$0xff] %v286_v41  ;;  %v292_v53 = vadd.f32 %v164_v50, %v164_v50  ;;  %v166_v55 = vld [vmem:[%s902_s30 + $0xe0] sm:$0xff]  ;;  %v167_v56 = vld [vmem:[%s902_s30 + $0xe8] sm:$0xff]  ;;  %415 = vst [vmem:[%s917_s17 + $0xa8] sm:$0xff] %v287_v45  ;;  %v293_v57 = vadd.f32 %v165_v54, %v165_v54 }
  0x46   : > { %416 = vst [vmem:[%s917_s17 + $0xb0] sm:$0xff] %v288_v46  ;;  %417 = vst [vmem:[%s917_s17 + $0xb8] sm:$0xff] %v289_v47  ;;  %v294_v58 = vadd.f32 %v166_v55, %v166_v55  ;;  %v295_v59 = vadd.f32 %v167_v56, %v167_v56  ;;  %v168_v60 = vld [vmem:[%s902_s30 + $0xf0] sm:$0xff]  ;;  %v169_v61 = vld [vmem:[%s902_s30 + $0xf8] sm:$0xff] }
  0x47   : > { %v170_v62 = vld [vmem:[%s902_s30 + $0x100] sm:$0xff]  ;;  %418 = vst [vmem:[%s917_s17 + $0xc0] sm:$0xff] %v290_v51  ;;  %419 = vst [vmem:[%s917_s17 + $0xc8] sm:$0xff] %v291_v52  ;;  %v296_v63 = vadd.f32 %v168_v60, %v168_v60  ;;  %v297_v0 = vadd.f32 %v169_v61, %v169_v61  ;;  %v171_v2 = vld [vmem:[%s902_s30 + $0x108] sm:$0xff] }
  0x48   : > { %420 = vst [vmem:[%s917_s17 + $0xd0] sm:$0xff] %v292_v53  ;;  %v298_v1 = vadd.f32 %v170_v62, %v170_v62  ;;  %v172_v3 = vld [vmem:[%s902_s30 + $0x110] sm:$0xff]  ;;  %v173_v4 = vld [vmem:[%s902_s30 + $0x118] sm:$0xff]  ;;  %421 = vst [vmem:[%s917_s17 + $0xd8] sm:$0xff] %v293_v57  ;;  %v299_v5 = vadd.f32 %v171_v2, %v171_v2 }
  0x49   : > { %422 = vst [vmem:[%s917_s17 + $0xe0] sm:$0xff] %v294_v58  ;;  %423 = vst [vmem:[%s917_s17 + $0xe8] sm:$0xff] %v295_v59  ;;  %v300_v6 = vadd.f32 %v172_v3, %v172_v3  ;;  %v301_v7 = vadd.f32 %v173_v4, %v173_v4  ;;  %v174_v8 = vld [vmem:[%s902_s30 + $0x120] sm:$0xff]  ;;  %v175_v9 = vld [vmem:[%s902_s30 + $0x128] sm:$0xff] }
  0x4a   : > { %v176_v10 = vld [vmem:[%s902_s30 + $0x130] sm:$0xff]  ;;  %424 = vst [vmem:[%s917_s17 + $0xf0] sm:$0xff] %v296_v63  ;;  %425 = vst [vmem:[%s917_s17 + $0xf8] sm:$0xff] %v297_v0  ;;  %v302_v11 = vadd.f32 %v174_v8, %v174_v8  ;;  %v303_v12 = vadd.f32 %v175_v9, %v175_v9  ;;  %v177_v14 = vld [vmem:[%s902_s30 + $0x138] sm:$0xff] }
  0x4b   : > { %426 = vst [vmem:[%s917_s17 + $0x100] sm:$0xff] %v298_v1  ;;  %v304_v13 = vadd.f32 %v176_v10, %v176_v10  ;;  %v178_v15 = vld [vmem:[%s902_s30 + $0x140] sm:$0xff]  ;;  %v179_v16 = vld [vmem:[%s902_s30 + $0x148] sm:$0xff]  ;;  %427 = vst [vmem:[%s917_s17 + $0x108] sm:$0xff] %v299_v5  ;;  %v305_v17 = vadd.f32 %v177_v14, %v177_v14 }
  0x4c   : > { %428 = vst [vmem:[%s917_s17 + $0x110] sm:$0xff] %v300_v6  ;;  %429 = vst [vmem:[%s917_s17 + $0x118] sm:$0xff] %v301_v7  ;;  %v306_v18 = vadd.f32 %v178_v15, %v178_v15  ;;  %v307_v19 = vadd.f32 %v179_v16, %v179_v16  ;;  %v180_v20 = vld [vmem:[%s902_s30 + $0x150] sm:$0xff]  ;;  %v181_v21 = vld [vmem:[%s902_s30 + $0x158] sm:$0xff] }
  0x4d   : > { %v182_v22 = vld [vmem:[%s902_s30 + $0x160] sm:$0xff]  ;;  %430 = vst [vmem:[%s917_s17 + $0x120] sm:$0xff] %v302_v11  ;;  %431 = vst [vmem:[%s917_s17 + $0x128] sm:$0xff] %v303_v12  ;;  %v308_v23 = vadd.f32 %v180_v20, %v180_v20  ;;  %v309_v24 = vadd.f32 %v181_v21, %v181_v21  ;;  %v183_v26 = vld [vmem:[%s902_s30 + $0x168] sm:$0xff] }
  0x4e   : > { %432 = vst [vmem:[%s917_s17 + $0x130] sm:$0xff] %v304_v13  ;;  %v310_v25 = vadd.f32 %v182_v22, %v182_v22  ;;  %v184_v27 = vld [vmem:[%s902_s30 + $0x170] sm:$0xff]  ;;  %v185_v28 = vld [vmem:[%s902_s30 + $0x178] sm:$0xff]  ;;  %433 = vst [vmem:[%s917_s17 + $0x138] sm:$0xff] %v305_v17  ;;  %v311_v29 = vadd.f32 %v183_v26, %v183_v26 }
  0x4f   : > { %434 = vst [vmem:[%s917_s17 + $0x140] sm:$0xff] %v306_v18  ;;  %435 = vst [vmem:[%s917_s17 + $0x148] sm:$0xff] %v307_v19  ;;  %v312_v30 = vadd.f32 %v184_v27, %v184_v27  ;;  %v313_v31 = vadd.f32 %v185_v28, %v185_v28  ;;  %v186_v32 = vld [vmem:[%s902_s30 + $0x180] sm:$0xff]  ;;  %v187_v33 = vld [vmem:[%s902_s30 + $0x188] sm:$0xff] }
  0x50   : > { %v188_v34 = vld [vmem:[%s902_s30 + $0x190] sm:$0xff]  ;;  %436 = vst [vmem:[%s917_s17 + $0x150] sm:$0xff] %v308_v23  ;;  %437 = vst [vmem:[%s917_s17 + $0x158] sm:$0xff] %v309_v24  ;;  %v314_v35 = vadd.f32 %v186_v32, %v186_v32  ;;  %v315_v36 = vadd.f32 %v187_v33, %v187_v33  ;;  %v189_v38 = vld [vmem:[%s902_s30 + $0x198] sm:$0xff] }
  0x51   : > { %438 = vst [vmem:[%s917_s17 + $0x160] sm:$0xff] %v310_v25  ;;  %v316_v37 = vadd.f32 %v188_v34, %v188_v34  ;;  %v190_v39 = vld [vmem:[%s902_s30 + $0x1a0] sm:$0xff]  ;;  %v191_v40 = vld [vmem:[%s902_s30 + $0x1a8] sm:$0xff]  ;;  %439 = vst [vmem:[%s917_s17 + $0x168] sm:$0xff] %v311_v29  ;;  %v317_v41 = vadd.f32 %v189_v38, %v189_v38 }
  0x52   : > { %440 = vst [vmem:[%s917_s17 + $0x170] sm:$0xff] %v312_v30  ;;  %441 = vst [vmem:[%s917_s17 + $0x178] sm:$0xff] %v313_v31  ;;  %v318_v42 = vadd.f32 %v190_v39, %v190_v39  ;;  %v319_v43 = vadd.f32 %v191_v40, %v191_v40  ;;  %v192_v44 = vld [vmem:[%s902_s30 + $0x1b0] sm:$0xff]  ;;  %v193_v45 = vld [vmem:[%s902_s30 + $0x1b8] sm:$0xff] }
  0x53   : > { %v194_v46 = vld [vmem:[%s902_s30 + $0x1c0] sm:$0xff]  ;;  %442 = vst [vmem:[%s917_s17 + $0x180] sm:$0xff] %v314_v35  ;;  %443 = vst [vmem:[%s917_s17 + $0x188] sm:$0xff] %v315_v36  ;;  %v320_v47 = vadd.f32 %v192_v44, %v192_v44  ;;  %v321_v48 = vadd.f32 %v193_v45, %v193_v45  ;;  %v195_v50 = vld [vmem:[%s902_s30 + $0x1c8] sm:$0xff] }
  0x54   : > { %444 = vst [vmem:[%s917_s17 + $0x190] sm:$0xff] %v316_v37  ;;  %v322_v49 = vadd.f32 %v194_v46, %v194_v46  ;;  %v196_v51 = vld [vmem:[%s902_s30 + $0x1d0] sm:$0xff]  ;;  %v197_v52 = vld [vmem:[%s902_s30 + $0x1d8] sm:$0xff]  ;;  %445 = vst [vmem:[%s917_s17 + $0x198] sm:$0xff] %v317_v41  ;;  %v323_v53 = vadd.f32 %v195_v50, %v195_v50 }
  0x55   : > { %446 = vst [vmem:[%s917_s17 + $0x1a0] sm:$0xff] %v318_v42  ;;  %447 = vst [vmem:[%s917_s17 + $0x1a8] sm:$0xff] %v319_v43  ;;  %v324_v54 = vadd.f32 %v196_v51, %v196_v51  ;;  %v325_v55 = vadd.f32 %v197_v52, %v197_v52  ;;  %v198_v56 = vld [vmem:[%s902_s30 + $0x1e0] sm:$0xff]  ;;  %v199_v57 = vld [vmem:[%s902_s30 + $0x1e8] sm:$0xff] }
  0x56   : > { %v200_v58 = vld [vmem:[%s902_s30 + $0x1f0] sm:$0xff]  ;;  %448 = vst [vmem:[%s917_s17 + $0x1b0] sm:$0xff] %v320_v47  ;;  %449 = vst [vmem:[%s917_s17 + $0x1b8] sm:$0xff] %v321_v48  ;;  %v326_v59 = vadd.f32 %v198_v56, %v198_v56  ;;  %v327_v60 = vadd.f32 %v199_v57, %v199_v57  ;;  %v201_v62 = vld [vmem:[%s902_s30 + $0x1f8] sm:$0xff] }
  0x57   : > { %450 = vst [vmem:[%s917_s17 + $0x1c0] sm:$0xff] %v322_v49  ;;  %v328_v61 = vadd.f32 %v200_v58, %v200_v58  ;;  %v202_v63 = vld [vmem:[%s902_s30 + $0x200] sm:$0xff]  ;;  %v203_v0 = vld [vmem:[%s902_s30 + $0x208] sm:$0xff]  ;;  %451 = vst [vmem:[%s917_s17 + $0x1c8] sm:$0xff] %v323_v53  ;;  %v329_v1 = vadd.f32 %v201_v62, %v201_v62 }
  0x58   : > { %452 = vst [vmem:[%s917_s17 + $0x1d0] sm:$0xff] %v324_v54  ;;  %453 = vst [vmem:[%s917_s17 + $0x1d8] sm:$0xff] %v325_v55  ;;  %v330_v2 = vadd.f32 %v202_v63, %v202_v63  ;;  %v331_v3 = vadd.f32 %v203_v0, %v203_v0  ;;  %v204_v4 = vld [vmem:[%s902_s30 + $0x210] sm:$0xff]  ;;  %v205_v5 = vld [vmem:[%s902_s30 + $0x218] sm:$0xff] }
  0x59   : > { %v206_v6 = vld [vmem:[%s902_s30 + $0x220] sm:$0xff]  ;;  %454 = vst [vmem:[%s917_s17 + $0x1e0] sm:$0xff] %v326_v59  ;;  %455 = vst [vmem:[%s917_s17 + $0x1e8] sm:$0xff] %v327_v60  ;;  %v332_v7 = vadd.f32 %v204_v4, %v204_v4  ;;  %v333_v8 = vadd.f32 %v205_v5, %v205_v5  ;;  %v207_v10 = vld [vmem:[%s902_s30 + $0x228] sm:$0xff] }
  0x5a   : > { %456 = vst [vmem:[%s917_s17 + $0x1f0] sm:$0xff] %v328_v61  ;;  %v334_v9 = vadd.f32 %v206_v6, %v206_v6  ;;  %v208_v11 = vld [vmem:[%s902_s30 + $0x230] sm:$0xff]  ;;  %v209_v12 = vld [vmem:[%s902_s30 + $0x238] sm:$0xff]  ;;  %457 = vst [vmem:[%s917_s17 + $0x1f8] sm:$0xff] %v329_v1  ;;  %v335_v13 = vadd.f32 %v207_v10, %v207_v10 }
  0x5b   : > { %458 = vst [vmem:[%s917_s17 + $0x200] sm:$0xff] %v330_v2  ;;  %459 = vst [vmem:[%s917_s17 + $0x208] sm:$0xff] %v331_v3  ;;  %v336_v14 = vadd.f32 %v208_v11, %v208_v11  ;;  %v337_v15 = vadd.f32 %v209_v12, %v209_v12  ;;  %v210_v16 = vld [vmem:[%s902_s30 + $0x240] sm:$0xff]  ;;  %v211_v17 = vld [vmem:[%s902_s30 + $0x248] sm:$0xff] }
  0x5c   : > { %v212_v18 = vld [vmem:[%s902_s30 + $0x250] sm:$0xff]  ;;  %460 = vst [vmem:[%s917_s17 + $0x210] sm:$0xff] %v332_v7  ;;  %461 = vst [vmem:[%s917_s17 + $0x218] sm:$0xff] %v333_v8  ;;  %v338_v19 = vadd.f32 %v210_v16, %v210_v16  ;;  %v339_v20 = vadd.f32 %v211_v17, %v211_v17  ;;  %v213_v22 = vld [vmem:[%s902_s30 + $0x258] sm:$0xff] }
  0x5d   : > { %462 = vst [vmem:[%s917_s17 + $0x220] sm:$0xff] %v334_v9  ;;  %v340_v21 = vadd.f32 %v212_v18, %v212_v18  ;;  %v214_v23 = vld [vmem:[%s902_s30 + $0x260] sm:$0xff]  ;;  %v215_v24 = vld [vmem:[%s902_s30 + $0x268] sm:$0xff]  ;;  %463 = vst [vmem:[%s917_s17 + $0x228] sm:$0xff] %v335_v13  ;;  %v341_v25 = vadd.f32 %v213_v22, %v213_v22 }
  0x5e   : > { %464 = vst [vmem:[%s917_s17 + $0x230] sm:$0xff] %v336_v14  ;;  %465 = vst [vmem:[%s917_s17 + $0x238] sm:$0xff] %v337_v15  ;;  %v342_v26 = vadd.f32 %v214_v23, %v214_v23  ;;  %v343_v27 = vadd.f32 %v215_v24, %v215_v24  ;;  %v216_v28 = vld [vmem:[%s902_s30 + $0x270] sm:$0xff]  ;;  %v217_v29 = vld [vmem:[%s902_s30 + $0x278] sm:$0xff] }
  0x5f   : > { %v218_v30 = vld [vmem:[%s902_s30 + $0x280] sm:$0xff]  ;;  %466 = vst [vmem:[%s917_s17 + $0x240] sm:$0xff] %v338_v19  ;;  %467 = vst [vmem:[%s917_s17 + $0x248] sm:$0xff] %v339_v20  ;;  %v344_v31 = vadd.f32 %v216_v28, %v216_v28  ;;  %v345_v32 = vadd.f32 %v217_v29, %v217_v29  ;;  %v219_v34 = vld [vmem:[%s902_s30 + $0x288] sm:$0xff] }
  0x60   : > { %468 = vst [vmem:[%s917_s17 + $0x250] sm:$0xff] %v340_v21  ;;  %v346_v33 = vadd.f32 %v218_v30, %v218_v30  ;;  %v220_v35 = vld [vmem:[%s902_s30 + $0x290] sm:$0xff]  ;;  %v221_v36 = vld [vmem:[%s902_s30 + $0x298] sm:$0xff]  ;;  %469 = vst [vmem:[%s917_s17 + $0x258] sm:$0xff] %v341_v25  ;;  %v347_v37 = vadd.f32 %v219_v34, %v219_v34 }
  0x61   : > { %470 = vst [vmem:[%s917_s17 + $0x260] sm:$0xff] %v342_v26  ;;  %471 = vst [vmem:[%s917_s17 + $0x268] sm:$0xff] %v343_v27  ;;  %v348_v38 = vadd.f32 %v220_v35, %v220_v35  ;;  %v349_v39 = vadd.f32 %v221_v36, %v221_v36  ;;  %v222_v40 = vld [vmem:[%s902_s30 + $0x2a0] sm:$0xff]  ;;  %v223_v41 = vld [vmem:[%s902_s30 + $0x2a8] sm:$0xff] }
  0x62   : > { %v224_v42 = vld [vmem:[%s902_s30 + $0x2b0] sm:$0xff]  ;;  %472 = vst [vmem:[%s917_s17 + $0x270] sm:$0xff] %v344_v31  ;;  %473 = vst [vmem:[%s917_s17 + $0x278] sm:$0xff] %v345_v32  ;;  %v350_v43 = vadd.f32 %v222_v40, %v222_v40  ;;  %v351_v44 = vadd.f32 %v223_v41, %v223_v41  ;;  %v225_v46 = vld [vmem:[%s902_s30 + $0x2b8] sm:$0xff] }
  0x63   : > { %474 = vst [vmem:[%s917_s17 + $0x280] sm:$0xff] %v346_v33  ;;  %v352_v45 = vadd.f32 %v224_v42, %v224_v42  ;;  %v226_v47 = vld [vmem:[%s902_s30 + $0x2c0] sm:$0xff]  ;;  %v227_v48 = vld [vmem:[%s902_s30 + $0x2c8] sm:$0xff]  ;;  %475 = vst [vmem:[%s917_s17 + $0x288] sm:$0xff] %v347_v37  ;;  %v353_v49 = vadd.f32 %v225_v46, %v225_v46 }
  0x64   : > { %476 = vst [vmem:[%s917_s17 + $0x290] sm:$0xff] %v348_v38  ;;  %477 = vst [vmem:[%s917_s17 + $0x298] sm:$0xff] %v349_v39  ;;  %v354_v50 = vadd.f32 %v226_v47, %v226_v47  ;;  %v355_v51 = vadd.f32 %v227_v48, %v227_v48  ;;  %v228_v52 = vld [vmem:[%s902_s30 + $0x2d0] sm:$0xff]  ;;  %v229_v53 = vld [vmem:[%s902_s30 + $0x2d8] sm:$0xff] }
  0x65   : > { %v230_v54 = vld [vmem:[%s902_s30 + $0x2e0] sm:$0xff]  ;;  %478 = vst [vmem:[%s917_s17 + $0x2a0] sm:$0xff] %v350_v43  ;;  %479 = vst [vmem:[%s917_s17 + $0x2a8] sm:$0xff] %v351_v44  ;;  %v356_v55 = vadd.f32 %v228_v52, %v228_v52  ;;  %v357_v56 = vadd.f32 %v229_v53, %v229_v53  ;;  %v231_v58 = vld [vmem:[%s902_s30 + $0x2e8] sm:$0xff] }
  0x66   : > { %480 = vst [vmem:[%s917_s17 + $0x2b0] sm:$0xff] %v352_v45  ;;  %v358_v57 = vadd.f32 %v230_v54, %v230_v54  ;;  %v232_v59 = vld [vmem:[%s902_s30 + $0x2f0] sm:$0xff]  ;;  %v233_v60 = vld [vmem:[%s902_s30 + $0x2f8] sm:$0xff]  ;;  %481 = vst [vmem:[%s917_s17 + $0x2b8] sm:$0xff] %v353_v49  ;;  %v359_v61 = vadd.f32 %v231_v58, %v231_v58 }
  0x67   : > { %482 = vst [vmem:[%s917_s17 + $0x2c0] sm:$0xff] %v354_v50  ;;  %483 = vst [vmem:[%s917_s17 + $0x2c8] sm:$0xff] %v355_v51  ;;  %v360_v62 = vadd.f32 %v232_v59, %v232_v59  ;;  %v361_v63 = vadd.f32 %v233_v60, %v233_v60  ;;  %v234_v0 = vld [vmem:[%s902_s30 + $0x300] sm:$0xff]  ;;  %v235_v1 = vld [vmem:[%s902_s30 + $0x308] sm:$0xff] }
  0x68   : > { %v236_v2 = vld [vmem:[%s902_s30 + $0x310] sm:$0xff]  ;;  %484 = vst [vmem:[%s917_s17 + $0x2d0] sm:$0xff] %v356_v55  ;;  %485 = vst [vmem:[%s917_s17 + $0x2d8] sm:$0xff] %v357_v56  ;;  %v362_v3 = vadd.f32 %v234_v0, %v234_v0  ;;  %v363_v4 = vadd.f32 %v235_v1, %v235_v1  ;;  %v237_v6 = vld [vmem:[%s902_s30 + $0x318] sm:$0xff] }
  0x69   : > { %486 = vst [vmem:[%s917_s17 + $0x2e0] sm:$0xff] %v358_v57  ;;  %v364_v5 = vadd.f32 %v236_v2, %v236_v2  ;;  %v238_v7 = vld [vmem:[%s902_s30 + $0x320] sm:$0xff]  ;;  %v239_v8 = vld [vmem:[%s902_s30 + $0x328] sm:$0xff]  ;;  %487 = vst [vmem:[%s917_s17 + $0x2e8] sm:$0xff] %v359_v61  ;;  %v365_v9 = vadd.f32 %v237_v6, %v237_v6 }
  0x6a   : > { %488 = vst [vmem:[%s917_s17 + $0x2f0] sm:$0xff] %v360_v62  ;;  %489 = vst [vmem:[%s917_s17 + $0x2f8] sm:$0xff] %v361_v63  ;;  %v366_v10 = vadd.f32 %v238_v7, %v238_v7  ;;  %v367_v11 = vadd.f32 %v239_v8, %v239_v8  ;;  %v240_v12 = vld [vmem:[%s902_s30 + $0x330] sm:$0xff]  ;;  %v241_v13 = vld [vmem:[%s902_s30 + $0x338] sm:$0xff] }
  0x6b   : > { %v242_v14 = vld [vmem:[%s902_s30 + $0x340] sm:$0xff]  ;;  %490 = vst [vmem:[%s917_s17 + $0x300] sm:$0xff] %v362_v3  ;;  %491 = vst [vmem:[%s917_s17 + $0x308] sm:$0xff] %v363_v4  ;;  %v368_v15 = vadd.f32 %v240_v12, %v240_v12  ;;  %v369_v16 = vadd.f32 %v241_v13, %v241_v13  ;;  %v243_v18 = vld [vmem:[%s902_s30 + $0x348] sm:$0xff] }
  0x6c   : > { %492 = vst [vmem:[%s917_s17 + $0x310] sm:$0xff] %v364_v5  ;;  %v370_v17 = vadd.f32 %v242_v14, %v242_v14  ;;  %v244_v19 = vld [vmem:[%s902_s30 + $0x350] sm:$0xff]  ;;  %v245_v20 = vld [vmem:[%s902_s30 + $0x358] sm:$0xff]  ;;  %493 = vst [vmem:[%s917_s17 + $0x318] sm:$0xff] %v365_v9  ;;  %v371_v21 = vadd.f32 %v243_v18, %v243_v18 }
  0x6d   : > { %494 = vst [vmem:[%s917_s17 + $0x320] sm:$0xff] %v366_v10  ;;  %495 = vst [vmem:[%s917_s17 + $0x328] sm:$0xff] %v367_v11  ;;  %v372_v22 = vadd.f32 %v244_v19, %v244_v19  ;;  %v373_v23 = vadd.f32 %v245_v20, %v245_v20  ;;  %v246_v24 = vld [vmem:[%s902_s30 + $0x360] sm:$0xff]  ;;  %v247_v25 = vld [vmem:[%s902_s30 + $0x368] sm:$0xff] }
  0x6e   : > { %v248_v26 = vld [vmem:[%s902_s30 + $0x370] sm:$0xff]  ;;  %496 = vst [vmem:[%s917_s17 + $0x330] sm:$0xff] %v368_v15  ;;  %497 = vst [vmem:[%s917_s17 + $0x338] sm:$0xff] %v369_v16  ;;  %v374_v27 = vadd.f32 %v246_v24, %v246_v24  ;;  %v375_v28 = vadd.f32 %v247_v25, %v247_v25  ;;  %v249_v30 = vld [vmem:[%s902_s30 + $0x378] sm:$0xff] }
  0x6f   : > { %498 = vst [vmem:[%s917_s17 + $0x340] sm:$0xff] %v370_v17  ;;  %v376_v29 = vadd.f32 %v248_v26, %v248_v26  ;;  %v250_v31 = vld [vmem:[%s902_s30 + $0x380] sm:$0xff]  ;;  %v251_v32 = vld [vmem:[%s902_s30 + $0x388] sm:$0xff]  ;;  %499 = vst [vmem:[%s917_s17 + $0x348] sm:$0xff] %v371_v21  ;;  %v377_v33 = vadd.f32 %v249_v30, %v249_v30 }
  0x70   : > { %500 = vst [vmem:[%s917_s17 + $0x350] sm:$0xff] %v372_v22  ;;  %501 = vst [vmem:[%s917_s17 + $0x358] sm:$0xff] %v373_v23  ;;  %v378_v34 = vadd.f32 %v250_v31, %v250_v31  ;;  %v379_v35 = vadd.f32 %v251_v32, %v251_v32  ;;  %v252_v36 = vld [vmem:[%s902_s30 + $0x390] sm:$0xff]  ;;  %v253_v37 = vld [vmem:[%s902_s30 + $0x398] sm:$0xff] }
  0x71   : > { %v254_v38 = vld [vmem:[%s902_s30 + $0x3a0] sm:$0xff]  ;;  %502 = vst [vmem:[%s917_s17 + $0x360] sm:$0xff] %v374_v27  ;;  %503 = vst [vmem:[%s917_s17 + $0x368] sm:$0xff] %v375_v28  ;;  %v380_v39 = vadd.f32 %v252_v36, %v252_v36  ;;  %v381_v40 = vadd.f32 %v253_v37, %v253_v37  ;;  %v255_v42 = vld [vmem:[%s902_s30 + $0x3a8] sm:$0xff] }
  0x72   : > { %504 = vst [vmem:[%s917_s17 + $0x370] sm:$0xff] %v376_v29  ;;  %v382_v41 = vadd.f32 %v254_v38, %v254_v38  ;;  %v256_v43 = vld [vmem:[%s902_s30 + $0x3b0] sm:$0xff]  ;;  %v257_v44 = vld [vmem:[%s902_s30 + $0x3b8] sm:$0xff]  ;;  %505 = vst [vmem:[%s917_s17 + $0x378] sm:$0xff] %v377_v33  ;;  %v383_v45 = vadd.f32 %v255_v42, %v255_v42 }
  0x73   : > { %506 = vst [vmem:[%s917_s17 + $0x380] sm:$0xff] %v378_v34  ;;  %507 = vst [vmem:[%s917_s17 + $0x388] sm:$0xff] %v379_v35  ;;  %v384_v46 = vadd.f32 %v256_v43, %v256_v43  ;;  %v385_v47 = vadd.f32 %v257_v44, %v257_v44  ;;  %v258_v48 = vld [vmem:[%s902_s30 + $0x3c0] sm:$0xff]  ;;  %v259_v49 = vld [vmem:[%s902_s30 + $0x3c8] sm:$0xff] }
  0x74   : > { %v260_v50 = vld [vmem:[%s902_s30 + $0x3d0] sm:$0xff]  ;;  %508 = vst [vmem:[%s917_s17 + $0x390] sm:$0xff] %v380_v39  ;;  %509 = vst [vmem:[%s917_s17 + $0x398] sm:$0xff] %v381_v40  ;;  %v386_v51 = vadd.f32 %v258_v48, %v258_v48  ;;  %v387_v52 = vadd.f32 %v259_v49, %v259_v49  ;;  %v261_v54 = vld [vmem:[%s902_s30 + $0x3d8] sm:$0xff] }
  0x75   : > { %510 = vst [vmem:[%s917_s17 + $0x3a0] sm:$0xff] %v382_v41  ;;  %v388_v53 = vadd.f32 %v260_v50, %v260_v50  ;;  %v262_v55 = vld [vmem:[%s902_s30 + $0x3e0] sm:$0xff]  ;;  %v263_v56 = vld [vmem:[%s902_s30 + $0x3e8] sm:$0xff]  ;;  %511 = vst [vmem:[%s917_s17 + $0x3a8] sm:$0xff] %v383_v45  ;;  %v389_v57 = vadd.f32 %v261_v54, %v261_v54 }
  0x76   : > { %512 = vst [vmem:[%s917_s17 + $0x3b0] sm:$0xff] %v384_v46  ;;  %513 = vst [vmem:[%s917_s17 + $0x3b8] sm:$0xff] %v385_v47  ;;  %v390_v58 = vadd.f32 %v262_v55, %v262_v55  ;;  %v391_v59 = vadd.f32 %v263_v56, %v263_v56  ;;  %v264_v60 = vld [vmem:[%s902_s30 + $0x3f0] sm:$0xff]  ;;  %v265_v61 = vld [vmem:[%s902_s30 + $0x3f8] sm:$0xff] }
  0x77   : > { %514 = vst [vmem:[%s917_s17 + $0x3c0] sm:$0xff] %v386_v51  ;;  %515 = vst [vmem:[%s917_s17 + $0x3c8] sm:$0xff] %v387_v52  ;;  %v392_v62 = vadd.f32 %v264_v60, %v264_v60  ;;  %v393_v63 = vadd.f32 %v265_v61, %v265_v61 }
  0x78   : > { %516 = vst [vmem:[%s917_s17 + $0x3d0] sm:$0xff] %v388_v53  ;;  %517 = vst [vmem:[%s917_s17 + $0x3d8] sm:$0xff] %v389_v57 }
  0x79   : > { %518 = vst [vmem:[%s917_s17 + $0x3e0] sm:$0xff] %v390_v58  ;;  %519 = vst [vmem:[%s917_s17 + $0x3e8] sm:$0xff] %v391_v59 }
  0x7a   : > { %520 = vst [vmem:[%s917_s17 + $0x3f0] sm:$0xff] %v392_v62  ;;  %521 = vst [vmem:[%s917_s17 + $0x3f8] sm:$0xff] %v393_v63 }
  0x7b   : > { %723 = shalt.err (!%p720_p2)
}
  0x7c   : > { %s724_s13 = scalar_lea.hbm %s1163_s29, 16384  ;;  %s728_s20 = scalar_lea.hbm %s1218_s1, 32768 }
  0x7d   : > { %p725_p4 = scmp.ne.s32.totalorder %s1163_s29, %s724_s13  ;;  %p729_p9 = scmp.lt.u32.totalorder %s1163_s29, %s1218_s1 }
  0x7e   : > { %p730_p1 = scmp.lt.u32.totalorder %s728_s20, %s724_s13  ;;  %p732_p6 = scmp.lt.u32.totalorder %s724_s13, %s1163_s29 }
  0x7f   : > { %p726_p5 = pnand %p725_p4, %p1225_p11 }
  0x80   : > { %p731_p3 = por %p730_p1, %p729_p9 }
  0x81   : > { %p727_p7 = pneg %p726_p5 }
  0x82   : > { %p733_p12 = por %p732_p6, %p731_p3 }
  0x84   : > { %p734_p13 = pnand %p733_p12, %p727_p7 }
  0x86   : > { %737 = shalt.err (!%p734_p13)
}
  0x87   : > { %s782_s24 = smov 512   ;;  %s783_s26 = smov 32  }
  0x88   : > { %632 = dma.vmem_to_hbm [thread:$0]  (%p1225_p11), %s1165_s27, 16384, %s1163_s29, %s523_s2, %s782_s24, %s782_s24, %s783_s26  }
  0x89 PF: > { %s552_s30 = sand.u32 1, %s764_s6   ;;  %p1226_p8 = scmp.ne.s32.totalorder %s1223_s19, 0 }
  0x8a   : > { %p1227_p10 = scmp.ge.s32.totalorder %s776_s9, 2  ;;  %s553_s17 = scalar_lea.sflag [#allocation4], %s552_s30 }
  0x8c   : > { %p639_p0 = pnand %p1227_p10, %p1226_p8 }
  0x8e   : > { %759 = dma.done.wait (!%p639_p0), %s553_s17, 16384  }
  0x8f   : > { %761 = vsyncadd (!%p639_p0), %s553_s17, 4294950912  ;;  %p14_p2 = scmp.ge.s32.totalorder %s819_s12, 4   ;;  %s1228_s6 = smov %s768_s7 }
  0x90   : > { %s1229_s7 = smov %s772_s8  ;;  %s1230_s8 = smov %s831_s15 }
  0x91   : > { %s1231_s9 = smov %s819_s12  ;;  %16 = sbr.rel (!%p14_p2) target bundleno = 5 (0x5), region = 69 }
  0x98   :  { %558 = vsyncpa [#allocation3], 1 }
  0x99   :  { %560 = vsyncpa [#allocation3 + $0x1], 1 }
  0x9a   :  { %561 = vsyncpa [#allocation4], 1 }
  0x9b   :  { %563 = vsyncpa [#allocation4 + $0x1], 1 }

</bundles_post_ra>
